<compile_context>
chip_gen: v5e
topology: v5e:2x2
jax: 0.10.0
libtpu: 0.0.40
codegen_flags: <defaults>
</compile_context>

<pallas_src>
import jax
import jax.numpy as jnp
import numpy as np
from jax import lax
from jax.experimental import pallas as pl
from jax.experimental.pallas import tpu as pltpu


def _round_up(v, m):
    return (v + m - 1) // m * m


def _round_down_min(v, m):
    return max(m, (v // m) * m)


def _choose_tiling(B, HW, C_in, C_out, dsz_x, dsz_out, budget_bytes):
    """Pick (batch_block, spatial_tile) from an explicit VMEM budget.

    Per lane of the spatial tile (per batch element) we pay:
      2x double-buffered x (C_in), 2x double-buffered outputs (C_out) and an
      f32 accumulator (C_out).
    """
    per_lane = 2 * C_in * dsz_x + 2 * C_out * dsz_out + C_out * 4

    if HW <= 128:
        thw = HW                                     # full extent: always legal
    else:
        max_thw = _round_down_min(budget_bytes // per_lane, 128)
        thw = min(max_thw, _round_up(HW, 128))       # 128-multiple, cdiv grid

    # Batch blocking: amortize per-grid-step overhead when one spatial tile
    # already covers all of H*W.
    bt = 1
    if thw >= HW:
        bt = int(min(B, max(1, 1024 // max(thw, 1))))
        while bt > 1 and bt * thw * per_lane > budget_bytes:
            bt -= 1

    # Megacore (v7x): keep >=2 grid steps whenever the problem allows so both
    # TensorCores get work under dimension_semantics=("parallel","parallel").
    def n_steps(bt_, thw_):
        return pl.cdiv(B, bt_) * pl.cdiv(HW, thw_)

    while bt > 1 and n_steps(bt, thw) < 2:
        bt -= 1
    if n_steps(bt, thw) < 2 and HW > 128:
        thw = max(128, _round_up(pl.cdiv(HW, 2), 128))

    return bt, thw


def _build_cblinear_call(B, C_in, HW, c2s, bt, thw, x_dtype, w_dtype,
                         out_dtype, single_buffer_consts, vmem_limit_bytes):
    """Build the pallas_call for one CBLinear problem size."""
    C_out = sum(c2s)
    n_chunks = len(c2s)
    offs = tuple(int(o) for o in np.concatenate([[0], np.cumsum(c2s)])[:-1])

    def kernel(w_ref, b_ref, x_ref, *out_refs):
        # w_ref : (C_out, C_in)       resident (constant index map)
        # b_ref : (C_out, 1)  f32     resident (constant index map)
        # x_ref : (bt, C_in, thw)     streamed input tile (model dtype)
        # out_refs[j] : (bt, c2s[j], thw) lane-dense output tiles
        w = w_ref[...]
        bias = b_ref[...]

        def body(i, carry):
            # (C_out, thw) = (C_out, C_in) @ (C_in, thw) on the MXU, f32 acc.
            y = jnp.dot(w, x_ref[i], preferred_element_type=jnp.float32) + bias
            for j in range(n_chunks):                     # static channel split
                out_refs[j][i] = y[offs[j]:offs[j] + c2s[j], :].astype(
                    out_refs[j].dtype)
            return carry

        lax.fori_loop(0, bt, body, 0, unroll=True)

    def _const_spec(shape):
        # Constant block -> DMA'd once; single-buffer it to reclaim VMEM.
        if single_buffer_consts:
            return pl.BlockSpec(shape, lambda bi, si: (0,) * len(shape),
                                pipeline_mode=pl.Buffered(1))
        return pl.BlockSpec(shape, lambda bi, si: (0,) * len(shape))

    in_specs = [
        _const_spec((C_out, C_in)),                              # weight
        _const_spec((C_out, 1)),                                 # bias
        pl.BlockSpec((bt, C_in, thw), lambda bi, si: (bi, 0, si)),  # x stream
    ]
    out_specs = tuple(
        pl.BlockSpec((bt, c, thw), lambda bi, si: (bi, 0, si)) for c in c2s)
    out_shape = tuple(
        jax.ShapeDtypeStruct((B, c, HW), out_dtype) for c in c2s)

    dsz_x = jnp.dtype(x_dtype).itemsize
    dsz_w = jnp.dtype(w_dtype).itemsize
    dsz_o = jnp.dtype(out_dtype).itemsize
    cost = pl.CostEstimate(
        flops=2 * B * C_out * C_in * HW,
        transcendentals=0,
        bytes_accessed=(B * C_in * HW * dsz_x + C_out * C_in * dsz_w
                        + C_out * 4 + B * C_out * HW * dsz_o),
    )

    return pl.pallas_call(
        kernel,
        out_shape=out_shape,
        grid_spec=pltpu.PrefetchScalarGridSpec(
            num_scalar_prefetch=0,
            grid=(pl.cdiv(B, bt), pl.cdiv(HW, thw)),
            in_specs=in_specs,
            out_specs=out_specs,
        ),
        compiler_params=pltpu.CompilerParams(
            dimension_semantics=("parallel", "parallel"),
            vmem_limit_bytes=vmem_limit_bytes),
        cost_estimate=cost,
    )


def cblinear_forward(x, weight, bias, c2s, *, vmem_budget_bytes=20 << 20):
    """CBLinear forward: fused 1x1 conv + channel split.

    x      : (B, C_in, H, W)   NCHW, model dtype (f32 / bf16)
    weight : (sum(c2s), C_in)  squeezed 1x1 conv weight
    bias   : (sum(c2s),)
    returns tuple of (B, c2_i, H, W) arrays (== torch .split(c2s, dim=1)).
    """
    B, C_in, H, W = x.shape
    c2s = tuple(int(c) for c in c2s)
    C_out = sum(c2s)
    assert weight.shape == (C_out, C_in)
    HW = H * W

    # Keep x / W in the model dtype (no f32 up-cast); f32 accumulation happens
    # inside the kernel via preferred_element_type.  Bias stays f32 (tiny).
    w = weight.astype(x.dtype)
    b2d = bias.reshape(C_out, 1).astype(jnp.float32)
    x_flat = x.reshape(B, C_in, HW)
    out_dtype = x.dtype

    dsz_x = jnp.dtype(x.dtype).itemsize
    dsz_o = jnp.dtype(out_dtype).itemsize
    bt, thw = _choose_tiling(B, HW, C_in, C_out, dsz_x, dsz_o,
                             vmem_budget_bytes)

    # VMEM working set with (8,128) layout padding -> matching scoped limit.
    def _blk(chans, d):                      # one (bt, chans, thw) buffer
        return bt * _round_up(chans, 8) * _round_up(thw, 128) * d

    working = (2 * _blk(C_in, dsz_x)                              # x (2 bufs)
               + 2 * sum(_blk(c, dsz_o) for c in c2s)             # y (2 bufs)
               + _blk(C_out, 4)                                   # f32 acc
               + _round_up(C_out, 8) * _round_up(C_in, 128) * w.dtype.itemsize
               + _round_up(C_out, 8) * 128 * 4)                   # bias
    vmem_limit = int(min(64 << 20,
                         max(16 << 20, int(working * 1.5) + (2 << 20))))

    def _call(single_buffer_consts):
        return _build_cblinear_call(
            B, C_in, HW, c2s, bt, thw, x.dtype, w.dtype, out_dtype,
            single_buffer_consts, vmem_limit)(w, b2d, x_flat)

    try:
        outs = _call(True)       # weight/bias single-buffered (constant block)
    except Exception:            # fallback for jax without pipeline_mode
        outs = _call(False)

    return tuple(o.reshape(B, c, H, W) for o, c in zip(outs, c2s))


def init_params(key, c1, c2s):
    """PyTorch Conv2d default init: U(-1/sqrt(fan_in), 1/sqrt(fan_in)) for
    weight and bias (fan_in = c1 * 1 * 1 for a 1x1 conv)."""
    c_out = sum(c2s)
    kw, kb = jax.random.split(key)
    bound = 1.0 / np.sqrt(c1)
    weight = jax.random.uniform(kw, (c_out, c1), jnp.float32, -bound, bound)
    bias = jax.random.uniform(kb, (c_out,), jnp.float32, -bound, bound)
    return weight, bias


if __name__ == "__main__":
    # Module hyperparameters (CBLinear defaults: k=1, s=1, p=0, g=1).
    c1 = 16
    c2s = (8, 16, 8)          # sum = 32 output channels, split 3 ways
    B, H, W = 2, 16, 16       # H*W = 256 -> one 256-lane tile per batch

    key = jax.random.PRNGKey(0)
    kx, kp = jax.random.split(key)
    x = jax.random.normal(kx, (B, c1, H, W), jnp.float32)
    weight, bias = init_params(kp, c1, c2s)

    outs = cblinear_forward(x, weight, bias, c2s)
    jax.block_until_ready(outs)

    # shape check against the PyTorch module's outputs
    assert len(outs) == len(c2s)
    for o, c in zip(outs, c2s):
        assert o.shape == (B, c, H, W)

    # numeric sanity check against a pure-JAX reference of the 1x1 conv
    y_ref = (jnp.einsum("oc,bchw->bohw", weight, x,
                        precision=lax.Precision.HIGHEST)
             + bias[None, :, None, None])
    y_ker = jnp.concatenate(outs, axis=1)
    np.testing.assert_allclose(np.asarray(y_ker), np.asarray(y_ref),
                               rtol=2e-3, atol=2e-3)

    print("KERNEL_OK")
</pallas_src>

<mosaic_0001>
module attributes {stable_mosaic.version = 11 : i64} {
  func.func @kernel(%arg0: i32, %arg1: i32, %arg2: memref<32x16xf32, #tpu.memory_space<vmem>>, %arg3: memref<32x1xf32, #tpu.memory_space<vmem>>, %arg4: memref<1x16x256xf32, #tpu.memory_space<vmem>>, %arg5: memref<1x8x256xf32, #tpu.memory_space<vmem>>, %arg6: memref<1x16x256xf32, #tpu.memory_space<vmem>>, %arg7: memref<1x8x256xf32, #tpu.memory_space<vmem>>) attributes {dimension_semantics = [#tpu.dimension_semantics<parallel>, #tpu.dimension_semantics<parallel>], iteration_bounds = array<i64: 2, 1>, scalar_prefetch = 0 : i64, scratch_operands = 0 : i64, tpu.core_type = #tpu.core_type<tc>, window_params = [{pipeline_mode = #tpu.pipeline_mode<synchronous>, transform_indices = @transform_0, window_bounds = array<i64: 32, 16>}, {pipeline_mode = #tpu.pipeline_mode<synchronous>, transform_indices = @transform_1, window_bounds = array<i64: 32, 1>}, {transform_indices = @transform_2, window_bounds = array<i64: 1, 16, 256>}, {transform_indices = @transform_3, window_bounds = array<i64: 1, 8, 256>}, {transform_indices = @transform_4, window_bounds = array<i64: 1, 16, 256>}, {transform_indices = @transform_5, window_bounds = array<i64: 1, 8, 256>}]} {
    %c0 = arith.constant 0 : index
    %c0_0 = arith.constant 0 : index
    %0 = vector.load %arg2[%c0, %c0_0] : memref<32x16xf32, #tpu.memory_space<vmem>>, vector<32x16xf32>
    %c0_1 = arith.constant 0 : index
    %c0_2 = arith.constant 0 : index
    %1 = vector.load %arg3[%c0_1, %c0_2] : memref<32x1xf32, #tpu.memory_space<vmem>>, vector<32x1xf32>
    %c0_i32 = arith.constant 0 : i32
    %2 = arith.index_cast %c0_i32 : i32 to index
    %c0_3 = arith.constant 0 : index
    %c0_4 = arith.constant 0 : index
    %3 = vector.load %arg4[%2, %c0_3, %c0_4] : memref<1x16x256xf32, #tpu.memory_space<vmem>>, vector<1x16x256xf32>
    %4 = vector.shape_cast %3 : vector<1x16x256xf32> to vector<16x256xf32>
    %cst = arith.constant dense<0.000000e+00> : vector<32x256xf32>
    %5 = tpu.matmul %0, %4, %cst {dimension_numbers = #tpu.dot_dimension_numbers<[1], [0], [0], [1], [0, 0, 1, 1], [], []>} : vector<32x16xf32>, vector<16x256xf32>, vector<32x256xf32> -> vector<32x256xf32>
    %6 = vector.broadcast %1 : vector<32x1xf32> to vector<32x256xf32>
    %7 = arith.addf %5, %6 : vector<32x256xf32>
    %8 = vector.extract_strided_slice %7 {offsets = [0, 0], sizes = [8, 256], strides = [1, 1]} : vector<32x256xf32> to vector<8x256xf32>
    %9 = arith.index_cast %c0_i32 : i32 to index
    %c0_5 = arith.constant 0 : index
    %c0_6 = arith.constant 0 : index
    %10 = vector.load %arg5[%9, %c0_5, %c0_6] : memref<1x8x256xf32, #tpu.memory_space<vmem>>, vector<1x8x256xf32>
    %11 = vector.shape_cast %10 : vector<1x8x256xf32> to vector<8x256xf32>
    %12 = vector.shape_cast %8 : vector<8x256xf32> to vector<1x8x256xf32>
    tpu.vector_store %arg5[%9, %c0_5, %c0_6], %12 {strides = array<i32>} : memref<1x8x256xf32, #tpu.memory_space<vmem>>, vector<1x8x256xf32>,
    %13 = vector.extract_strided_slice %7 {offsets = [8, 0], sizes = [16, 256], strides = [1, 1]} : vector<32x256xf32> to vector<16x256xf32>
    %14 = arith.index_cast %c0_i32 : i32 to index
    %c0_7 = arith.constant 0 : index
    %c0_8 = arith.constant 0 : index
    %15 = vector.load %arg6[%14, %c0_7, %c0_8] : memref<1x16x256xf32, #tpu.memory_space<vmem>>, vector<1x16x256xf32>
    %16 = vector.shape_cast %15 : vector<1x16x256xf32> to vector<16x256xf32>
    %17 = vector.shape_cast %13 : vector<16x256xf32> to vector<1x16x256xf32>
    tpu.vector_store %arg6[%14, %c0_7, %c0_8], %17 {strides = array<i32>} : memref<1x16x256xf32, #tpu.memory_space<vmem>>, vector<1x16x256xf32>,
    %18 = vector.extract_strided_slice %7 {offsets = [24, 0], sizes = [8, 256], strides = [1, 1]} : vector<32x256xf32> to vector<8x256xf32>
    %19 = arith.index_cast %c0_i32 : i32 to index
    %c0_9 = arith.constant 0 : index
    %c0_10 = arith.constant 0 : index
    %20 = vector.load %arg7[%19, %c0_9, %c0_10] : memref<1x8x256xf32, #tpu.memory_space<vmem>>, vector<1x8x256xf32>
    %21 = vector.shape_cast %20 : vector<1x8x256xf32> to vector<8x256xf32>
    %22 = vector.shape_cast %18 : vector<8x256xf32> to vector<1x8x256xf32>
    tpu.vector_store %arg7[%19, %c0_9, %c0_10], %22 {strides = array<i32>} : memref<1x8x256xf32, #tpu.memory_space<vmem>>, vector<1x8x256xf32>,
    %c1_i32 = arith.constant 1 : i32
    return
  }
  func.func @transform_0(%arg0: i32, %arg1: i32) -> (i32, i32) {
    %c0_i32 = arith.constant 0 : i32
    %c0_i32_0 = arith.constant 0 : i32
    %c0_i32_1 = arith.constant 0 : i32
    return %c0_i32, %c0_i32_0 : i32, i32
  }
  func.func @transform_1(%arg0: i32, %arg1: i32) -> (i32, i32) {
    %c0_i32 = arith.constant 0 : i32
    %c0_i32_0 = arith.constant 0 : i32
    %c0_i32_1 = arith.constant 0 : i32
    return %c0_i32, %c0_i32_0 : i32, i32
  }
  func.func @transform_2(%arg0: i32, %arg1: i32) -> (i32, i32, i32) {
    %c0_i32 = arith.constant 0 : i32
    %c0_i32_0 = arith.constant 0 : i32
    return %arg0, %c0_i32, %arg1 : i32, i32, i32
  }
  func.func @transform_3(%arg0: i32, %arg1: i32) -> (i32, i32, i32) {
    %c0_i32 = arith.constant 0 : i32
    %c0_i32_0 = arith.constant 0 : i32
    return %arg0, %c0_i32, %arg1 : i32, i32, i32
  }
  func.func @transform_4(%arg0: i32, %arg1: i32) -> (i32, i32, i32) {
    %c0_i32 = arith.constant 0 : i32
    %c0_i32_0 = arith.constant 0 : i32
    return %arg0, %c0_i32, %arg1 : i32, i32, i32
  }
  func.func @transform_5(%arg0: i32, %arg1: i32) -> (i32, i32, i32) {
    %c0_i32 = arith.constant 0 : i32
    %c0_i32_0 = arith.constant 0 : i32
    return %arg0, %c0_i32, %arg1 : i32, i32, i32
  }
}

module attributes {stable_mosaic.version = 11 : i64} {
  func.func @kernel(%arg0: i32, %arg1: i32, %arg2: memref<32x16xf32, #tpu.memory_space<vmem>>, %arg3: memref<32x1xf32, #tpu.memory_space<vmem>>, %arg4: memref<1x16x256xf32, #tpu.memory_space<vmem>>, %arg5: memref<1x8x256xf32, #tpu.memory_space<vmem>>, %arg6: memref<1x16x256xf32, #tpu.memory_space<vmem>>, %arg7: memref<1x8x256xf32, #tpu.memory_space<vmem>>) attributes {dimension_semantics = [#tpu.dimension_semantics<parallel>, #tpu.dimension_semantics<parallel>], iteration_bounds = array<i64: 2, 1>, scalar_prefetch = 0 : i64, scratch_operands = 0 : i64, tpu.core_type = #tpu.core_type<tc>, window_params = [{pipeline_mode = #tpu.pipeline_mode<synchronous>, transform_indices = @transform_0, window_bounds = array<i64: 32, 16>}, {pipeline_mode = #tpu.pipeline_mode<synchronous>, transform_indices = @transform_1, window_bounds = array<i64: 32, 1>}, {transform_indices = @transform_2, window_bounds = array<i64: 1, 16, 256>}, {transform_indices = @transform_3, window_bounds = array<i64: 1, 8, 256>}, {transform_indices = @transform_4, window_bounds = array<i64: 1, 16, 256>}, {transform_indices = @transform_5, window_bounds = array<i64: 1, 8, 256>}]} {
    %c0 = arith.constant 0 : index
    %c0_0 = arith.constant 0 : index
    %0 = vector.load %arg2[%c0, %c0_0] : memref<32x16xf32, #tpu.memory_space<vmem>>, vector<32x16xf32>
    %c0_1 = arith.constant 0 : index
    %c0_2 = arith.constant 0 : index
    %1 = vector.load %arg3[%c0_1, %c0_2] : memref<32x1xf32, #tpu.memory_space<vmem>>, vector<32x1xf32>
    %c0_i32 = arith.constant 0 : i32
    %2 = arith.index_cast %c0_i32 : i32 to index
    %c0_3 = arith.constant 0 : index
    %c0_4 = arith.constant 0 : index
    %3 = vector.load %arg4[%2, %c0_3, %c0_4] : memref<1x16x256xf32, #tpu.memory_space<vmem>>, vector<1x16x256xf32>
    %4 = vector.shape_cast %3 : vector<1x16x256xf32> to vector<16x256xf32>
    %cst = arith.constant dense<0.000000e+00> : vector<32x256xf32>
    %5 = tpu.matmul %0, %4, %cst {dimension_numbers = #tpu.dot_dimension_numbers<[1], [0], [0], [1], [0, 0, 1, 1], [], []>} : vector<32x16xf32>, vector<16x256xf32>, vector<32x256xf32> -> vector<32x256xf32>
    %6 = vector.broadcast %1 : vector<32x1xf32> to vector<32x256xf32>
    %7 = arith.addf %5, %6 : vector<32x256xf32>
    %8 = vector.extract_strided_slice %7 {offsets = [0, 0], sizes = [8, 256], strides = [1, 1]} : vector<32x256xf32> to vector<8x256xf32>
    %9 = arith.index_cast %c0_i32 : i32 to index
    %c0_5 = arith.constant 0 : index
    %c0_6 = arith.constant 0 : index
    %10 = vector.load %arg5[%9, %c0_5, %c0_6] : memref<1x8x256xf32, #tpu.memory_space<vmem>>, vector<1x8x256xf32>
    %11 = vector.shape_cast %10 : vector<1x8x256xf32> to vector<8x256xf32>
    %12 = vector.shape_cast %8 : vector<8x256xf32> to vector<1x8x256xf32>
    tpu.vector_store %arg5[%9, %c0_5, %c0_6], %12 {strides = array<i32>} : memref<1x8x256xf32, #tpu.memory_space<vmem>>, vector<1x8x256xf32>,
    %13 = vector.extract_strided_slice %7 {offsets = [8, 0], sizes = [16, 256], strides = [1, 1]} : vector<32x256xf32> to vector<16x256xf32>
    %14 = arith.index_cast %c0_i32 : i32 to index
    %c0_7 = arith.constant 0 : index
    %c0_8 = arith.constant 0 : index
    %15 = vector.load %arg6[%14, %c0_7, %c0_8] : memref<1x16x256xf32, #tpu.memory_space<vmem>>, vector<1x16x256xf32>
    %16 = vector.shape_cast %15 : vector<1x16x256xf32> to vector<16x256xf32>
    %17 = vector.shape_cast %13 : vector<16x256xf32> to vector<1x16x256xf32>
    tpu.vector_store %arg6[%14, %c0_7, %c0_8], %17 {strides = array<i32>} : memref<1x16x256xf32, #tpu.memory_space<vmem>>, vector<1x16x256xf32>,
    %18 = vector.extract_strided_slice %7 {offsets = [24, 0], sizes = [8, 256], strides = [1, 1]} : vector<32x256xf32> to vector<8x256xf32>
    %19 = arith.index_cast %c0_i32 : i32 to index
    %c0_9 = arith.constant 0 : index
    %c0_10 = arith.constant 0 : index
    %20 = vector.load %arg7[%19, %c0_9, %c0_10] : memref<1x8x256xf32, #tpu.memory_space<vmem>>, vector<1x8x256xf32>
    %21 = vector.shape_cast %20 : vector<1x8x256xf32> to vector<8x256xf32>
    %22 = vector.shape_cast %18 : vector<8x256xf32> to vector<1x8x256xf32>
    tpu.vector_store %arg7[%19, %c0_9, %c0_10], %22 {strides = array<i32>} : memref<1x8x256xf32, #tpu.memory_space<vmem>>, vector<1x8x256xf32>,
    %c1_i32 = arith.constant 1 : i32
    return
  }
  func.func @transform_0(%arg0: i32, %arg1: i32) -> (i32, i32) {
    %c0_i32 = arith.constant 0 : i32
    %c0_i32_0 = arith.constant 0 : i32
    %c0_i32_1 = arith.constant 0 : i32
    return %c0_i32, %c0_i32_0 : i32, i32
  }
  func.func @transform_1(%arg0: i32, %arg1: i32) -> (i32, i32) {
    %c0_i32 = arith.constant 0 : i32
    %c0_i32_0 = arith.constant 0 : i32
    %c0_i32_1 = arith.constant 0 : i32
    return %c0_i32, %c0_i32_0 : i32, i32
  }
  func.func @transform_2(%arg0: i32, %arg1: i32) -> (i32, i32, i32) {
    %c0_i32 = arith.constant 0 : i32
    %c0_i32_0 = arith.constant 0 : i32
    return %arg0, %c0_i32, %arg1 : i32, i32, i32
  }
  func.func @transform_3(%arg0: i32, %arg1: i32) -> (i32, i32, i32) {
    %c0_i32 = arith.constant 0 : i32
    %c0_i32_0 = arith.constant 0 : i32
    return %arg0, %c0_i32, %arg1 : i32, i32, i32
  }
  func.func @transform_4(%arg0: i32, %arg1: i32) -> (i32, i32, i32) {
    %c0_i32 = arith.constant 0 : i32
    %c0_i32_0 = arith.constant 0 : i32
    return %arg0, %c0_i32, %arg1 : i32, i32, i32
  }
  func.func @transform_5(%arg0: i32, %arg1: i32) -> (i32, i32, i32) {
    %c0_i32 = arith.constant 0 : i32
    %c0_i32_0 = arith.constant 0 : i32
    return %arg0, %c0_i32, %arg1 : i32, i32, i32
  }
}

</mosaic_0001>

<bundles_post_ra>
// kernel: tpu_custom_call.1
= control target key start
LH: loop header
LB: loop body
LE: loop exit
PB: predicated region body
PF: predicated region fallthrough
CT: control target
= control target key end

     0   :  { %s1079_s0 = inlined_call_operand.vmem [shape: f32[32,16], index: 0, kind: input, shape index: {}]   ;;  %s1080_s1 = inlined_call_operand.vmem [shape: f32[32,1], index: 1, kind: input, shape index: {}]   ;;  %s1081_s2 = inlined_call_operand.vmem [shape: f32[2,16,256], index: 2, kind: input, shape index: {}]   ;;  %s1082_s3 = inlined_call_operand.hbm [shape: f32[2,8,256], index: 3, kind: output, shape index: {0}]   ;;  %s1083_s4 = inlined_call_operand.hbm [shape: f32[2,16,256], index: 4, kind: output, shape index: {1}]   ;;  %s1084_s5 = inlined_call_operand.hbm [shape: f32[2,8,256], index: 5, kind: output, shape index: {2}]  }
   0x1   :  { %1088 = sst [smem:[#allocation9_spill]] %s1079_s0 }
   0x2   :  { %1089 = sst [smem:[#allocation10_spill]] %s1080_s1 }
   0x3   :  { %11 = vsyncpa [#allocation3], 0 }
   0x4   :  { %13 = vsyncpa [#allocation3 + $0x1], 0 }
   0x5   :  { %14 = vsyncpa [#allocation5], 0 }
   0x6   :  { %16 = vsyncpa [#allocation5 + $0x1], 0  ;;  %s879_s18 = smov 0   ;;  %s881_s19 = smov 0  }
   0x7   :  { %s883_s20 = smov 0   ;;  %s885_s21 = smov 0  }
   0x8   :  { %s887_s22 = smov 0   ;;  %s889_s23 = smov 0  }
   0x9 LB: > { %s599_s24 = sadd.s32 4294967295, %s844_s23   ;;  %s1085_s25 = sadd.s32 4294967294, %s844_s23   ;;  %s844_s23 = sphi %s889_s23, %s22_s23   ;;  %s840_s22 = sphi %s887_s22, %s1101_s22   ;;  %s836_s21 = sphi %s885_s21, %s1100_s21   ;;  %s832_s20 = sphi %s883_s20, %s1099_s20   ;;  %s828_s19 = sphi %s881_s19, %s1098_s19   ;;  %s824_s18 = sphi %s879_s18, %s1097_s18  }
   0xa   : > { %s34_s26 = sadd.s32 1, %s840_s22  ;;  %s113_s27 = sadd.s32 1, %s832_s20 }
   0xb   : > { %p36_p0 = scmp.ge.s32.totalorder %s34_s26, 2  ;;  %p123_p1 = scmp.ne.s32.totalorder %s832_s20, %s828_s19 }
   0xc   : > { %p124_p2 = scmp.eq.s32.totalorder %s599_s24, 1  ;;  %p129_p3 = scmp.ne.s32.totalorder %s828_s19, %s824_s18 }
   0xd   : > { %s1103_s26 = smov (%p36_p0, %s34_s26), 0  ;;  %p130_p5 = scmp.eq.s32.totalorder %s1085_s25, 1 }
   0xe   : > { %p921_p4 = por %p124_p2, %p123_p1  ;;  %s108_s29 = ssub.s32 %s840_s22, %s1103_s26 }
   0xf   : > { %p603_p6 = scmp.ge.s32.totalorder %s844_s23, 1  ;;  %p111_p7 = scmp.eq.s32.totalorder %s108_s29, 0 }
  0x10   : > { %p930_p8 = por %p130_p5, %p129_p3  ;;  %p223_p9 = scmp.lt.s32.totalorder %s844_s23, 3 }
  0x11   : > { %s936_s6 = scalar_select %p111_p7, %s832_s20, %s113_s27  }
  0x12   : > { %p224_p10 = pnand %p603_p6, %p223_p9 }
  0x13   : > { %p266_p11 = scmp.lt.s32.totalorder (!%p224_p10), %s836_s21, 1  ;;  %s1092_s1 = sld [smem:[#allocation10_spill]] (!%p224_p10) }
  0x14   : > { %227 = sbr.rel (%p224_p10) target bundleno = 201 (0xc9), region = 32  ;;  %s1093_s0 = sld [smem:[#allocation9_spill]] (!%p224_p10) }
  0x15   : > { %s1087_s16 = sshll.u32 (!%p224_p10), %s836_s21, 4  ;;  %s999_s25 = sand.u32 (!%p224_p10), 1, %s599_s24  }
  0x16   : > { %s413_s7 = scalar_lea.hbm (!%p224_p10), %s1082_s3, %s1087_s16 }
  0x17   : > { %s417_s10 = sshll.u32 (!%p224_p10), %s413_s7, 4  ;;  %s418_s10 = int_to_ptr.hbm [resolvable:$true] %s417_s10 }
  0x18   : > { %s720_s16 = sshra.s32 (!%p224_p10), %s418_s10, 4  ;;  %s721_s16 = int_to_ptr.hbm [resolvable:$true] %s720_s16 }
  0x19   : > { %v283_v0 = vld [vmem:[%s1092_s1 + $0x8] sm:$0xff]  ;;  %v846_v1 = vmov 0   ;;  %v282_v2 = vld [vmem:[%s1092_s1] sm:$0xff]  ;;  %s267_s11 = scalar_select %p266_p11, %s836_s21, 1  ;;  %vm310_vm0 = vcmask 130048   ;;  %v284_v9 = vld [vmem:[%s1092_s1 + $0x10] sm:$0xff] }
  0x1a   : > { %704 = vset.pattern.permute.xlu0 %v846_v1  ;;  %705 = vset.pattern.permute.xlu1 %v846_v1  ;;  %v278_v7 = vld [vmem:[%s1093_s0] sm:$0xff]  ;;  %v280_v8 = vld [vmem:[%s1093_s0 + $0x10] sm:$0xff]  ;;  %v285_v10 = vld [vmem:[%s1092_s1 + $0x18] sm:$0xff]  ;;  %p727_p1 = scmp.lt.s32.totalorder %s721_s16, %s1082_s3 }
  0x1b   : > { %297 = vperm.xlu0 %704, %v283_v0   ;;  %292 = vperm.xlu1 %705, %v282_v2   ;;  %s628_s12 = sshll.u32 %s267_s11, 5  ;;  %v279_v11 = vld [vmem:[%s1093_s0 + $0x8] sm:$0xff]  ;;  %v281_v12 = vld [vmem:[%s1093_s0 + $0x18] sm:$0xff]  ;;  %s722_s0 = scalar_lea.hbm %s721_s16, 16 }
  0x1c   : > { %s273_s15 = scalar_lea.vmem %s1081_s2, %s628_s12  ;;  %s630_s12 = sshll.u32 %s836_s21, 5 }
  0x1d   : > { %v288_v3 = vld [vmem:[%s273_s15 + $0x10] sm:$0xff]  ;;  %v289_v4 = vld [vmem:[%s273_s15 + $0x18] sm:$0xff]  ;;  %v286_v5 = vld [vmem:[%s273_s15] sm:$0xff]  ;;  %s992_s27 = scalar_lea.hbm %s1083_s4, %s630_s12  ;;  %p723_p12 = scmp.ne.s32.totalorder %s721_s16, %s722_s0 }
  0x1e   : > { %337 = vmatpush.msra.mxu0 %v288_v3  ;;  %632 = vmatpush.msra.mxu2 %v288_v3  ;;  %v287_v6 = vld [vmem:[%s273_s15 + $0x8] sm:$0xff]  ;;  %s976_s15 = sand.u32 1, %s828_s19  }
  0x1f   : > { %366 = vmatpush.msra.mxu1 %v289_v4  ;;  %634 = vmatpush.msra.mxu3 %v289_v4  ;;  %s1086_s17 = sshll.u32 %s976_s15, 4  ;;  %s605_s11 = sshll.u32 %s976_s15, 5 }
  0x20   : > { %338 = vmatpush.msra.mxu0 %v286_v5  ;;  %633 = vmatpush.msra.mxu2 %v286_v5  ;;  %s250_s8 = scalar_lea.vmem [#allocation2], %s1086_s17  ;;  %s994_s29 = scalar_lea.vmem [#allocation4], %s605_s11 }
  0x21   : > { %367 = vmatpush.msra.mxu1 %v287_v6  ;;  %635 = vmatpush.msra.mxu3 %v287_v6  ;;  %s415_s9 = sshll.u32 %s250_s8, 4  ;;  %s431_s7 = sshll.u32 %s994_s29, 4  ;;  %s416_s9 = int_to_ptr.vmem [resolvable:$true] %s415_s9  ;;  %s1013_s7 = int_to_ptr.vmem [resolvable:$true] %s431_s7 }
  0x22   : > { %609 = vmatmul.msk.f32.vlgmr.msra.gmra.mxu0 %vm310_vm0, %v278_v7  ;;  %611 = vmatmul.msk.f32.vlgmr.msra.gmra.mxu2 %vm310_vm0, %v280_v8  ;;  %s390_s17 = scalar_lea.sflag [#allocation3], %s976_s15  ;;  %p724_p13 = pnand %p723_p12, %p921_p4 }
  0x23   : > { %613 = vmatmul.msk.f32.vlgmr.msra.gmra.mxu1 %vm310_vm0, %v278_v7  ;;  %615 = vmatmul.msk.f32.vlgmr.msra.gmra.mxu3 %vm310_vm0, %v280_v8 }
  0x24   : > { %302 = vperm.xlu0 %704, %v284_v9   ;;  %307 = vperm.xlu1 %705, %v285_v10   ;;  %p725_p0 = pneg %p724_p13 }
  0x2a   : > { %610 = vmatmul.msk.f32.gmra.mxu0 %vm310_vm0, %v279_v11  ;;  %612 = vmatmul.msk.f32.gmra.mxu2 %vm310_vm0, %v281_v12 }
  0x2b   : > { %614 = vmatmul.msk.f32.gmra.mxu1 %vm310_vm0, %v279_v11  ;;  %616 = vmatmul.msk.f32.gmra.mxu3 %vm310_vm0, %v281_v12 }
  0x8d   : > { %v298_v13 = vpop.permute.xlu0 %297  ;;  %v293_v14 = vpop.permute.xlu1 %292 }
  0x96   : > { %v303_v19 = vpop.permute.xlu0 %302 }
  0x9f   : > { %v340_v15 = vpop.f32.mrf.mxu0 }
  0xa0   : > { %v341_v16 = vadd.f32 %v340_v15, %v293_v14  ;;  %v369_v17 = vpop.f32.mrf.mxu1 }
  0xa1   : > { %v370_v18 = vadd.f32 %v369_v17, %v293_v14 }
  0xa2   : > { %381 = vst [vmem:[%s250_s8] sm:$0xff] %v341_v16 }
  0xa3   : > { %382 = vst [vmem:[%s250_s8 + $0x8] sm:$0xff] %v370_v18  ;;  %s726_s8 = scalar_lea.hbm %s1082_s3, 32 }
  0xa4   : > { %p728_p2 = scmp.lt.s32.totalorder %s726_s8, %s722_s0 }
  0xa6   : > { %p729_p3 = por %p728_p2, %p727_p1 }
  0xa8   : > { %p730_p5 = pnand %p729_p3, %p725_p0 }
  0xaa   : > { %733 = shalt.err (!%p730_p5)
}
  0xab   : > { %636 = dma.vmem_to_hbm [thread:$0]  (%p921_p4), %s416_s9, 256, %s418_s10, %s390_s17   ;;  %v346_v20 = vpop.f32.mrf.mxu2  ;;  %v375_v22 = vpop.f32.mrf.mxu3 }
  0xac   : > { %s433_s24 = sshll.u32 %s992_s27, 4  ;;  %v347_v21 = vadd.f32 %v346_v20, %v303_v19  ;;  %v376_v23 = vadd.f32 %v375_v22, %v303_v19  ;;  %v343_v24 = vpop.f32.mrf.mxu0  ;;  %v372_v26 = vpop.f32.mrf.mxu1  ;;  %s1094_s0 = sshll.u32 %s836_s21, 4  ;;  %s434_s24 = int_to_ptr.hbm [resolvable:$true] %s433_s24 }
  0xad   : > { %v344_v25 = vadd.f32 %v343_v24, %v298_v13  ;;  %s1021_s17 = scalar_lea.hbm %s1084_s5, %s1094_s0  ;;  %v373_v27 = vadd.f32 %v372_v26, %v298_v13  ;;  %s1095_s9 = sshll.u32 %s976_s15, 4 }
  0xae   : > { %385 = vst [vmem:[%s994_s29 + $0x10] sm:$0xff] %v347_v21  ;;  %s264_s10 = scalar_lea.vmem [#allocation6], %s1095_s9  ;;  %s453_s12 = sshll.u32 %s1021_s17, 4  ;;  %s454_s12 = int_to_ptr.hbm [resolvable:$true] %s453_s12 }
  0xaf   : > { %386 = vst [vmem:[%s994_s29 + $0x18] sm:$0xff] %v376_v23  ;;  %s451_s27 = sshll.u32 %s264_s10, 4  ;;  %s395_s8 = scalar_lea.sflag [#allocation5], %s999_s25  ;;  %s452_s27 = int_to_ptr.vmem [resolvable:$true] %s451_s27 }
  0xb0   : > { %383 = vst [vmem:[%s994_s29] sm:$0xff] %v344_v25  ;;  %s748_s14 = sshra.s32 %s434_s24, 4  ;;  %s754_s16 = scalar_lea.hbm %s1083_s4, 64  ;;  %s749_s14 = int_to_ptr.hbm [resolvable:$true] %s748_s14 }
  0xb1   : > { %384 = vst [vmem:[%s994_s29 + $0x8] sm:$0xff] %v373_v27  ;;  %s750_s11 = scalar_lea.hbm %s749_s14, 32  ;;  %p755_p10 = scmp.lt.s32.totalorder %s749_s14, %s1083_s4 }
  0xb2   : > { %p751_p6 = scmp.ne.s32.totalorder %s749_s14, %s750_s11  ;;  %p756_p11 = scmp.lt.s32.totalorder %s754_s16, %s750_s11 }
  0xb4   : > { %p752_p7 = pnand %p751_p6, %p921_p4  ;;  %p757_p12 = por %p756_p11, %p755_p10 }
  0xb6   : > { %p753_p9 = pneg %p752_p7 }
  0xb8   : > { %p758_p13 = pnand %p757_p12, %p753_p9 }
  0xba   : > { %761 = shalt.err (!%p758_p13)
}
  0xbb   : > { %s847_s15 = smov 256   ;;  %s848_s29 = smov 16   ;;  %v308_v28 = vpop.permute.xlu1 %307  ;;  %v349_v29 = vpop.f32.mrf.mxu2 }
  0xbc   : > { %637 = dma.vmem_to_hbm [thread:$0]  (%p921_p4), %s1013_s7, 512, %s434_s24, %s395_s8, %s847_s15, %s847_s15, %s848_s29   ;;  %v350_v30 = vadd.f32 %v349_v29, %v308_v28  ;;  %v378_v31 = vpop.f32.mrf.mxu3 }
  0xbd   : > { %v379_v32 = vadd.f32 %v378_v31, %v308_v28  ;;  %s776_s1 = sshra.s32 %s454_s12, 4  ;;  %s782_s7 = scalar_lea.hbm %s1084_s5, 32  ;;  %s777_s1 = int_to_ptr.hbm [resolvable:$true] %s776_s1 }
  0xbe   : > { %387 = vst [vmem:[%s264_s10] sm:$0xff] %v350_v30  ;;  %s778_s17 = scalar_lea.hbm %s777_s1, 16  ;;  %p783_p3 = scmp.lt.s32.totalorder %s777_s1, %s1084_s5 }
  0xbf   : > { %388 = vst [vmem:[%s264_s10 + $0x8] sm:$0xff] %v379_v32  ;;  %p779_p0 = scmp.ne.s32.totalorder %s777_s1, %s778_s17  ;;  %p784_p5 = scmp.lt.s32.totalorder %s782_s7, %s778_s17 }
  0xc1   : > { %p780_p1 = pnand %p779_p0, %p921_p4  ;;  %p785_p6 = por %p784_p5, %p783_p3 }
  0xc3   : > { %p781_p2 = pneg %p780_p1 }
  0xc5   : > { %p786_p7 = pnand %p785_p6, %p781_p2 }
  0xc7   : > { %789 = shalt.err (!%p786_p7)
}
  0xc8   : > { %638 = dma.vmem_to_hbm [thread:$0]  (%p921_p4), %s452_s27, 256, %s454_s12, %s395_s8  }
  0xc9 PF: > { %p652_p9 = scmp.ge.s32.totalorder %s844_s23, 2  ;;  %s465_s10 = sand.u32 1, %s824_s18  }
  0xca   : > { %s466_s21 = scalar_lea.sflag [#allocation3], %s465_s10 }
  0xcb   : > { %p643_p10 = pnand %p652_p9, %p930_p8 }
  0xcd   : > { %p644_p11 = pneg %p643_p10 }
  0xcf   : > { %815 = dma.done.wait (%p644_p11), %s466_s21, 256  }
  0xd0   : > { %817 = vsyncadd (%p644_p11), %s466_s21, 4294967040  ;;  %s1096_s0 = sadd.s32 4294967294, %s844_s23  }
  0xd1   : > { %s475_s16 = sand.u32 1, %s1096_s0  }
  0xd2   : > { %s476_s13 = scalar_lea.sflag [#allocation5], %s475_s16 }
  0xd3   : > { %819 = dma.done.wait (%p644_p11), %s476_s13, 768  }
  0xd4   : > { %821 = vsyncadd (%p644_p11), %s476_s13, 4294966528  ;;  %s22_s23 = sadd.s32 1, %s844_s23   ;;  %s1097_s18 = smov %s828_s19 }
  0xd5   : > { %p19_p4 = scmp.ge.s32.totalorder %s22_s23, 4   ;;  %s1098_s19 = smov %s832_s20 }
  0xd6   : > { %s1099_s20 = smov %s936_s6  ;;  %s1100_s21 = smov %s840_s22 }
  0xd7   : > { %s1101_s22 = smov %s1103_s26  ;;  %21 = sbr.rel (!%p19_p4) target bundleno = 9 (0x9), region = 99 }
  0xdc   :  { %492 = vsyncpa [#allocation3], 1 }
  0xdd   :  { %494 = vsyncpa [#allocation3 + $0x1], 1 }
  0xde   :  { %495 = vsyncpa [#allocation5], 1 }
  0xdf   :  { %497 = vsyncpa [#allocation5 + $0x1], 1 }

// kernel: tpu_custom_call.1
= control target key start
LH: loop header
LB: loop body
LE: loop exit
PB: predicated region body
PF: predicated region fallthrough
CT: control target
= control target key end

     0   :  { %s1079_s0 = inlined_call_operand.vmem [shape: f32[32,16], index: 0, kind: input, shape index: {}]   ;;  %s1080_s1 = inlined_call_operand.vmem [shape: f32[32,1], index: 1, kind: input, shape index: {}]   ;;  %s1081_s2 = inlined_call_operand.vmem [shape: f32[2,16,256], index: 2, kind: input, shape index: {}]   ;;  %s1082_s3 = inlined_call_operand.hbm [shape: f32[2,8,256], index: 3, kind: output, shape index: {0}]   ;;  %s1083_s4 = inlined_call_operand.hbm [shape: f32[2,16,256], index: 4, kind: output, shape index: {1}]   ;;  %s1084_s5 = inlined_call_operand.hbm [shape: f32[2,8,256], index: 5, kind: output, shape index: {2}]  }
   0x1   :  { %1088 = sst [smem:[#allocation9_spill]] %s1079_s0 }
   0x2   :  { %1089 = sst [smem:[#allocation10_spill]] %s1080_s1 }
   0x3   :  { %11 = vsyncpa [#allocation3], 0 }
   0x4   :  { %13 = vsyncpa [#allocation3 + $0x1], 0 }
   0x5   :  { %14 = vsyncpa [#allocation5], 0 }
   0x6   :  { %16 = vsyncpa [#allocation5 + $0x1], 0  ;;  %s879_s18 = smov 0   ;;  %s881_s19 = smov 0  }
   0x7   :  { %s883_s20 = smov 0   ;;  %s885_s21 = smov 0  }
   0x8   :  { %s887_s22 = smov 0   ;;  %s889_s23 = smov 0  }
   0x9 LB: > { %s599_s24 = sadd.s32 4294967295, %s844_s23   ;;  %s1085_s25 = sadd.s32 4294967294, %s844_s23   ;;  %s844_s23 = sphi %s889_s23, %s22_s23   ;;  %s840_s22 = sphi %s887_s22, %s1101_s22   ;;  %s836_s21 = sphi %s885_s21, %s1100_s21   ;;  %s832_s20 = sphi %s883_s20, %s1099_s20   ;;  %s828_s19 = sphi %s881_s19, %s1098_s19   ;;  %s824_s18 = sphi %s879_s18, %s1097_s18  }
   0xa   : > { %s34_s26 = sadd.s32 1, %s840_s22  ;;  %s113_s27 = sadd.s32 1, %s832_s20 }
   0xb   : > { %p36_p0 = scmp.ge.s32.totalorder %s34_s26, 2  ;;  %p123_p1 = scmp.ne.s32.totalorder %s832_s20, %s828_s19 }
   0xc   : > { %p124_p2 = scmp.eq.s32.totalorder %s599_s24, 1  ;;  %p129_p3 = scmp.ne.s32.totalorder %s828_s19, %s824_s18 }
   0xd   : > { %s1103_s26 = smov (%p36_p0, %s34_s26), 0  ;;  %p130_p5 = scmp.eq.s32.totalorder %s1085_s25, 1 }
   0xe   : > { %p921_p4 = por %p124_p2, %p123_p1  ;;  %s108_s29 = ssub.s32 %s840_s22, %s1103_s26 }
   0xf   : > { %p603_p6 = scmp.ge.s32.totalorder %s844_s23, 1  ;;  %p111_p7 = scmp.eq.s32.totalorder %s108_s29, 0 }
  0x10   : > { %p930_p8 = por %p130_p5, %p129_p3  ;;  %p223_p9 = scmp.lt.s32.totalorder %s844_s23, 3 }
  0x11   : > { %s936_s6 = scalar_select %p111_p7, %s832_s20, %s113_s27  }
  0x12   : > { %p224_p10 = pnand %p603_p6, %p223_p9 }
  0x13   : > { %p266_p11 = scmp.lt.s32.totalorder (!%p224_p10), %s836_s21, 1  ;;  %s1092_s1 = sld [smem:[#allocation10_spill]] (!%p224_p10) }
  0x14   : > { %227 = sbr.rel (%p224_p10) target bundleno = 201 (0xc9), region = 32  ;;  %s1093_s0 = sld [smem:[#allocation9_spill]] (!%p224_p10) }
  0x15   : > { %s1087_s16 = sshll.u32 (!%p224_p10), %s836_s21, 4  ;;  %s999_s25 = sand.u32 (!%p224_p10), 1, %s599_s24  }
  0x16   : > { %s413_s7 = scalar_lea.hbm (!%p224_p10), %s1082_s3, %s1087_s16 }
  0x17   : > { %s417_s10 = sshll.u32 (!%p224_p10), %s413_s7, 4  ;;  %s418_s10 = int_to_ptr.hbm [resolvable:$true] %s417_s10 }
  0x18   : > { %s720_s16 = sshra.s32 (!%p224_p10), %s418_s10, 4  ;;  %s721_s16 = int_to_ptr.hbm [resolvable:$true] %s720_s16 }
  0x19   : > { %v283_v0 = vld [vmem:[%s1092_s1 + $0x8] sm:$0xff]  ;;  %v846_v1 = vmov 0   ;;  %v282_v2 = vld [vmem:[%s1092_s1] sm:$0xff]  ;;  %s267_s11 = scalar_select %p266_p11, %s836_s21, 1  ;;  %vm310_vm0 = vcmask 130048   ;;  %v284_v9 = vld [vmem:[%s1092_s1 + $0x10] sm:$0xff] }
  0x1a   : > { %704 = vset.pattern.permute.xlu0 %v846_v1  ;;  %705 = vset.pattern.permute.xlu1 %v846_v1  ;;  %v278_v7 = vld [vmem:[%s1093_s0] sm:$0xff]  ;;  %v280_v8 = vld [vmem:[%s1093_s0 + $0x10] sm:$0xff]  ;;  %v285_v10 = vld [vmem:[%s1092_s1 + $0x18] sm:$0xff]  ;;  %p727_p1 = scmp.lt.s32.totalorder %s721_s16, %s1082_s3 }
  0x1b   : > { %297 = vperm.xlu0 %704, %v283_v0   ;;  %292 = vperm.xlu1 %705, %v282_v2   ;;  %s628_s12 = sshll.u32 %s267_s11, 5  ;;  %v279_v11 = vld [vmem:[%s1093_s0 + $0x8] sm:$0xff]  ;;  %v281_v12 = vld [vmem:[%s1093_s0 + $0x18] sm:$0xff]  ;;  %s722_s0 = scalar_lea.hbm %s721_s16, 16 }
  0x1c   : > { %s273_s15 = scalar_lea.vmem %s1081_s2, %s628_s12  ;;  %s630_s12 = sshll.u32 %s836_s21, 5 }
  0x1d   : > { %v288_v3 = vld [vmem:[%s273_s15 + $0x10] sm:$0xff]  ;;  %v289_v4 = vld [vmem:[%s273_s15 + $0x18] sm:$0xff]  ;;  %v286_v5 = vld [vmem:[%s273_s15] sm:$0xff]  ;;  %s992_s27 = scalar_lea.hbm %s1083_s4, %s630_s12  ;;  %p723_p12 = scmp.ne.s32.totalorder %s721_s16, %s722_s0 }
  0x1e   : > { %337 = vmatpush.msra.mxu0 %v288_v3  ;;  %632 = vmatpush.msra.mxu2 %v288_v3  ;;  %v287_v6 = vld [vmem:[%s273_s15 + $0x8] sm:$0xff]  ;;  %s976_s15 = sand.u32 1, %s828_s19  }
  0x1f   : > { %366 = vmatpush.msra.mxu1 %v289_v4  ;;  %634 = vmatpush.msra.mxu3 %v289_v4  ;;  %s1086_s17 = sshll.u32 %s976_s15, 4  ;;  %s605_s11 = sshll.u32 %s976_s15, 5 }
  0x20   : > { %338 = vmatpush.msra.mxu0 %v286_v5  ;;  %633 = vmatpush.msra.mxu2 %v286_v5  ;;  %s250_s8 = scalar_lea.vmem [#allocation2], %s1086_s17  ;;  %s994_s29 = scalar_lea.vmem [#allocation4], %s605_s11 }
  0x21   : > { %367 = vmatpush.msra.mxu1 %v287_v6  ;;  %635 = vmatpush.msra.mxu3 %v287_v6  ;;  %s415_s9 = sshll.u32 %s250_s8, 4  ;;  %s431_s7 = sshll.u32 %s994_s29, 4  ;;  %s416_s9 = int_to_ptr.vmem [resolvable:$true] %s415_s9  ;;  %s1013_s7 = int_to_ptr.vmem [resolvable:$true] %s431_s7 }
  0x22   : > { %609 = vmatmul.msk.f32.vlgmr.msra.gmra.mxu0 %vm310_vm0, %v278_v7  ;;  %611 = vmatmul.msk.f32.vlgmr.msra.gmra.mxu2 %vm310_vm0, %v280_v8  ;;  %s390_s17 = scalar_lea.sflag [#allocation3], %s976_s15  ;;  %p724_p13 = pnand %p723_p12, %p921_p4 }
  0x23   : > { %613 = vmatmul.msk.f32.vlgmr.msra.gmra.mxu1 %vm310_vm0, %v278_v7  ;;  %615 = vmatmul.msk.f32.vlgmr.msra.gmra.mxu3 %vm310_vm0, %v280_v8 }
  0x24   : > { %302 = vperm.xlu0 %704, %v284_v9   ;;  %307 = vperm.xlu1 %705, %v285_v10   ;;  %p725_p0 = pneg %p724_p13 }
  0x2a   : > { %610 = vmatmul.msk.f32.gmra.mxu0 %vm310_vm0, %v279_v11  ;;  %612 = vmatmul.msk.f32.gmra.mxu2 %vm310_vm0, %v281_v12 }
  0x2b   : > { %614 = vmatmul.msk.f32.gmra.mxu1 %vm310_vm0, %v279_v11  ;;  %616 = vmatmul.msk.f32.gmra.mxu3 %vm310_vm0, %v281_v12 }
  0x8d   : > { %v298_v13 = vpop.permute.xlu0 %297  ;;  %v293_v14 = vpop.permute.xlu1 %292 }
  0x96   : > { %v303_v19 = vpop.permute.xlu0 %302 }
  0x9f   : > { %v340_v15 = vpop.f32.mrf.mxu0 }
  0xa0   : > { %v341_v16 = vadd.f32 %v340_v15, %v293_v14  ;;  %v369_v17 = vpop.f32.mrf.mxu1 }
  0xa1   : > { %v370_v18 = vadd.f32 %v369_v17, %v293_v14 }
  0xa2   : > { %381 = vst [vmem:[%s250_s8] sm:$0xff] %v341_v16 }
  0xa3   : > { %382 = vst [vmem:[%s250_s8 + $0x8] sm:$0xff] %v370_v18  ;;  %s726_s8 = scalar_lea.hbm %s1082_s3, 32 }
  0xa4   : > { %p728_p2 = scmp.lt.s32.totalorder %s726_s8, %s722_s0 }
  0xa6   : > { %p729_p3 = por %p728_p2, %p727_p1 }
  0xa8   : > { %p730_p5 = pnand %p729_p3, %p725_p0 }
  0xaa   : > { %733 = shalt.err (!%p730_p5)
}
  0xab   : > { %636 = dma.vmem_to_hbm [thread:$0]  (%p921_p4), %s416_s9, 256, %s418_s10, %s390_s17   ;;  %v346_v20 = vpop.f32.mrf.mxu2  ;;  %v375_v22 = vpop.f32.mrf.mxu3 }
  0xac   : > { %s433_s24 = sshll.u32 %s992_s27, 4  ;;  %v347_v21 = vadd.f32 %v346_v20, %v303_v19  ;;  %v376_v23 = vadd.f32 %v375_v22, %v303_v19  ;;  %v343_v24 = vpop.f32.mrf.mxu0  ;;  %v372_v26 = vpop.f32.mrf.mxu1  ;;  %s1094_s0 = sshll.u32 %s836_s21, 4  ;;  %s434_s24 = int_to_ptr.hbm [resolvable:$true] %s433_s24 }
  0xad   : > { %v344_v25 = vadd.f32 %v343_v24, %v298_v13  ;;  %s1021_s17 = scalar_lea.hbm %s1084_s5, %s1094_s0  ;;  %v373_v27 = vadd.f32 %v372_v26, %v298_v13  ;;  %s1095_s9 = sshll.u32 %s976_s15, 4 }
  0xae   : > { %385 = vst [vmem:[%s994_s29 + $0x10] sm:$0xff] %v347_v21  ;;  %s264_s10 = scalar_lea.vmem [#allocation6], %s1095_s9  ;;  %s453_s12 = sshll.u32 %s1021_s17, 4  ;;  %s454_s12 = int_to_ptr.hbm [resolvable:$true] %s453_s12 }
  0xaf   : > { %386 = vst [vmem:[%s994_s29 + $0x18] sm:$0xff] %v376_v23  ;;  %s451_s27 = sshll.u32 %s264_s10, 4  ;;  %s395_s8 = scalar_lea.sflag [#allocation5], %s999_s25  ;;  %s452_s27 = int_to_ptr.vmem [resolvable:$true] %s451_s27 }
  0xb0   : > { %383 = vst [vmem:[%s994_s29] sm:$0xff] %v344_v25  ;;  %s748_s14 = sshra.s32 %s434_s24, 4  ;;  %s754_s16 = scalar_lea.hbm %s1083_s4, 64  ;;  %s749_s14 = int_to_ptr.hbm [resolvable:$true] %s748_s14 }
  0xb1   : > { %384 = vst [vmem:[%s994_s29 + $0x8] sm:$0xff] %v373_v27  ;;  %s750_s11 = scalar_lea.hbm %s749_s14, 32  ;;  %p755_p10 = scmp.lt.s32.totalorder %s749_s14, %s1083_s4 }
  0xb2   : > { %p751_p6 = scmp.ne.s32.totalorder %s749_s14, %s750_s11  ;;  %p756_p11 = scmp.lt.s32.totalorder %s754_s16, %s750_s11 }
  0xb4   : > { %p752_p7 = pnand %p751_p6, %p921_p4  ;;  %p757_p12 = por %p756_p11, %p755_p10 }
  0xb6   : > { %p753_p9 = pneg %p752_p7 }
  0xb8   : > { %p758_p13 = pnand %p757_p12, %p753_p9 }
  0xba   : > { %761 = shalt.err (!%p758_p13)
}
  0xbb   : > { %s847_s15 = smov 256   ;;  %s848_s29 = smov 16   ;;  %v308_v28 = vpop.permute.xlu1 %307  ;;  %v349_v29 = vpop.f32.mrf.mxu2 }
  0xbc   : > { %637 = dma.vmem_to_hbm [thread:$0]  (%p921_p4), %s1013_s7, 512, %s434_s24, %s395_s8, %s847_s15, %s847_s15, %s848_s29   ;;  %v350_v30 = vadd.f32 %v349_v29, %v308_v28  ;;  %v378_v31 = vpop.f32.mrf.mxu3 }
  0xbd   : > { %v379_v32 = vadd.f32 %v378_v31, %v308_v28  ;;  %s776_s1 = sshra.s32 %s454_s12, 4  ;;  %s782_s7 = scalar_lea.hbm %s1084_s5, 32  ;;  %s777_s1 = int_to_ptr.hbm [resolvable:$true] %s776_s1 }
  0xbe   : > { %387 = vst [vmem:[%s264_s10] sm:$0xff] %v350_v30  ;;  %s778_s17 = scalar_lea.hbm %s777_s1, 16  ;;  %p783_p3 = scmp.lt.s32.totalorder %s777_s1, %s1084_s5 }
  0xbf   : > { %388 = vst [vmem:[%s264_s10 + $0x8] sm:$0xff] %v379_v32  ;;  %p779_p0 = scmp.ne.s32.totalorder %s777_s1, %s778_s17  ;;  %p784_p5 = scmp.lt.s32.totalorder %s782_s7, %s778_s17 }
  0xc1   : > { %p780_p1 = pnand %p779_p0, %p921_p4  ;;  %p785_p6 = por %p784_p5, %p783_p3 }
  0xc3   : > { %p781_p2 = pneg %p780_p1 }
  0xc5   : > { %p786_p7 = pnand %p785_p6, %p781_p2 }
  0xc7   : > { %789 = shalt.err (!%p786_p7)
}
  0xc8   : > { %638 = dma.vmem_to_hbm [thread:$0]  (%p921_p4), %s452_s27, 256, %s454_s12, %s395_s8  }
  0xc9 PF: > { %p652_p9 = scmp.ge.s32.totalorder %s844_s23, 2  ;;  %s465_s10 = sand.u32 1, %s824_s18  }
  0xca   : > { %s466_s21 = scalar_lea.sflag [#allocation3], %s465_s10 }
  0xcb   : > { %p643_p10 = pnand %p652_p9, %p930_p8 }
  0xcd   : > { %p644_p11 = pneg %p643_p10 }
  0xcf   : > { %815 = dma.done.wait (%p644_p11), %s466_s21, 256  }
  0xd0   : > { %817 = vsyncadd (%p644_p11), %s466_s21, 4294967040  ;;  %s1096_s0 = sadd.s32 4294967294, %s844_s23  }
  0xd1   : > { %s475_s16 = sand.u32 1, %s1096_s0  }
  0xd2   : > { %s476_s13 = scalar_lea.sflag [#allocation5], %s475_s16 }
  0xd3   : > { %819 = dma.done.wait (%p644_p11), %s476_s13, 768  }
  0xd4   : > { %821 = vsyncadd (%p644_p11), %s476_s13, 4294966528  ;;  %s22_s23 = sadd.s32 1, %s844_s23   ;;  %s1097_s18 = smov %s828_s19 }
  0xd5   : > { %p19_p4 = scmp.ge.s32.totalorder %s22_s23, 4   ;;  %s1098_s19 = smov %s832_s20 }
  0xd6   : > { %s1099_s20 = smov %s936_s6  ;;  %s1100_s21 = smov %s840_s22 }
  0xd7   : > { %s1101_s22 = smov %s1103_s26  ;;  %21 = sbr.rel (!%p19_p4) target bundleno = 9 (0x9), region = 99 }
  0xdc   :  { %492 = vsyncpa [#allocation3], 1 }
  0xdd   :  { %494 = vsyncpa [#allocation3 + $0x1], 1 }
  0xde   :  { %495 = vsyncpa [#allocation5], 1 }
  0xdf   :  { %497 = vsyncpa [#allocation5 + $0x1], 1 }

</bundles_post_ra>
